<compile_context>
chip_gen: v7x
topology: tpu7x:2x2x1
jax: 0.10.0
libtpu: 0.0.40
codegen_flags: <defaults>
</compile_context>

<pallas_src>
import math
import functools

import jax
import jax.numpy as jnp
from jax.experimental import pallas as pl
from jax.experimental.pallas import tpu as pltpu


def _round_up(x, m):
    return ((x + m - 1) // m) * m


# -----------------------------------------------------------------------------
# Pallas kernel: RBF expansion + cosine cutoff + filter_net, per pair tile
# -----------------------------------------------------------------------------
def _pair_kernel(d_ref, mu_s_ref, inv_s_ref, w_ref, b_ref, *out_refs,
                 cos_scale, cutoff, out_width):
    d = d_ref[...]                                       # (TP, 1) f32

    # SchNet Gaussian RBF: exp(-((d - mu) / scale)^2); the per-element divide
    # is folded into precomputed inv_scale / mu*inv_scale (done once in params).
    x = d * inv_s_ref[...] - mu_s_ref[...]               # (TP, R)
    f_ij = jnp.exp(-(x * x))                             # (TP, R)

    # Cosine attenuation; pi/cutoff prefolded into cos_scale.
    f_cut = 0.5 * (jnp.cos(d * cos_scale) + 1.0)
    f_cut = jnp.where(d < cutoff, f_cut, jnp.zeros_like(f_cut))   # (TP, 1)

    # filter_net (Dense: x @ W + b) on the MXU with f32 accumulation, then
    # attenuate.  K = n_rbf is tiny; the kernel is writeback-bound so the
    # matmul is filler — keep f32 operands for fidelity with the torch module.
    filt = jnp.dot(f_ij, w_ref[...], preferred_element_type=jnp.float32)
    filt = (filt + b_ref[...]) * f_cut                   # (TP, F_total)

    # Write each interaction block's slice straight to its own output — the
    # split never touches HBM a second time (no post-kernel slicing).
    for bi, o_ref in enumerate(out_refs):
        lo = bi * out_width
        o_ref[...] = filt[:, lo:lo + out_width].astype(o_ref.dtype)


def _choose_pair_tile(n_pairs, f_total):
    """Pick the pair-tile size (multiple of 8)."""
    tp = min(2048, _round_up(n_pairs, 8))
    # Keep the double-buffered (d + filters) tiles within a v7x-safe VMEM
    # budget (64 MiB physical per TC); v5e/v6e have headroom to spare.
    row_bytes = 4 * (1 + f_total)
    while tp > 8 and 2 * tp * row_bytes > 8 * 1024 * 1024:
        tp = _round_up(tp // 2, 8)
    # Guarantee >= 2 grid steps so v7x's two TensorCores both get work.
    while tp > 8 and -(-n_pairs // tp) < 2:
        tp = _round_up(tp // 2, 8)
    return tp


# -----------------------------------------------------------------------------
# Wrapper (PaiNNRepresentation.forward equivalent)
# -----------------------------------------------------------------------------
def painn_representation(d_ij, r_ij, atomic_numbers, params, *,
                         cutoff, nr_interaction_blocks, nr_atom_basis,
                         shared_filters, filters_dtype=jnp.float32):
    """
    d_ij:  (n_pairs, 1) f32   pairwise distances
    r_ij:  (n_pairs, 3) f32   pairwise displacement vectors
    atomic_numbers: (n_atoms,) int32
    params: dict with rbf_mu_scaled (1,R), rbf_inv_scale (1,R),
            filter_w (R, F_total), filter_b (1, F_total),
            embedding (n_emb, nr_atom_basis)
    """
    n_pairs = d_ij.shape[0]
    n_atoms = atomic_numbers.shape[0]
    n_rbf = params["rbf_mu_scaled"].shape[1]
    f_total = params["filter_w"].shape[1]
    block_width = 3 * nr_atom_basis

    d_ij = d_ij.astype(jnp.float32)
    r_ij = r_ij.astype(jnp.float32)

    # dir_ij: trivial (P,3) elementwise op — plain JAX (XLA fuses it into the
    # consumers); matches torch `r_ij / d_ij` exactly (no safe-divide).
    dir_ij = r_ij / d_ij

    # ---- pair kernel: filters, tiled over n_pairs ---------------------------
    if shared_filters:
        out_widths = [f_total]                 # f_total == 3 * nr_atom_basis
    else:
        out_widths = [block_width] * nr_interaction_blocks

    tp = _choose_pair_tile(n_pairs, f_total)
    grid = (pl.cdiv(n_pairs, tp),)             # partial last tile is masked

    out_shapes = tuple(jax.ShapeDtypeStruct((n_pairs, w), filters_dtype)
                       for w in out_widths)
    out_specs = [pl.BlockSpec((tp, w), lambda i: (i, 0)) for w in out_widths]

    filter_outs = pl.pallas_call(
        functools.partial(_pair_kernel,
                          cos_scale=float(math.pi / cutoff),
                          cutoff=float(cutoff),
                          out_width=out_widths[0]),
        grid=grid,
        in_specs=[
            pl.BlockSpec((tp, 1), lambda i: (i, 0)),           # d_ij tile
            pl.BlockSpec((1, n_rbf), lambda i: (0, 0)),        # mu * inv_scale
            pl.BlockSpec((1, n_rbf), lambda i: (0, 0)),        # inv_scale
            pl.BlockSpec((n_rbf, f_total), lambda i: (0, 0)),  # W (VMEM-resident)
            pl.BlockSpec((1, f_total), lambda i: (0, 0)),      # b (VMEM-resident)
        ],
        out_specs=out_specs,
        out_shape=out_shapes,
        compiler_params=pltpu.CompilerParams(
            dimension_semantics=("parallel",),
            vmem_limit_bytes=32 * 1024 * 1024),
    )(d_ij, params["rbf_mu_scaled"], params["rbf_inv_scale"],
      params["filter_w"], params["filter_b"])

    if shared_filters:
        filter_list = [filter_outs[0]] * nr_interaction_blocks
    else:
        filter_list = list(filter_outs)

    # ---- per-atom featurization: embedding lookup as a plain XLA gather -----
    # (a grid=(1,) Pallas kernel over a few KB is pure launch overhead; the
    # gather fuses with neighboring XLA ops).
    scalar_feat = jnp.take(params["embedding"],
                           atomic_numbers.astype(jnp.int32), axis=0)
    per_atom_scalar_feature = scalar_feat[:, None, :]             # (N, 1, F)
    per_atom_vector_feature = jnp.zeros(
        (n_atoms, 3, nr_atom_basis), dtype=per_atom_scalar_feature.dtype)

    return {
        "filters": filter_list,
        "dir_ij": dir_ij,
        "per_atom_scalar_feature": per_atom_scalar_feature,
        "per_atom_vector_feature": per_atom_vector_feature,
    }


# -----------------------------------------------------------------------------
# Deterministic parameter construction (module __init__ equivalent).
# All per-call constant prep (mu*inv_scale, inv_scale) is done once here.
# -----------------------------------------------------------------------------
def make_params(key, *, cutoff, n_rbf, nr_interaction_blocks, nr_atom_basis,
                shared_filters, max_atomic_number):
    if shared_filters:
        f_total = 3 * nr_atom_basis
    else:
        f_total = nr_interaction_blocks * nr_atom_basis * 3

    k_w, k_b, k_e = jax.random.split(key, 3)
    # SchNet RBF: centers linspaced on [0, cutoff], width tied to spacing.
    centers = jnp.linspace(0.0, cutoff, n_rbf, dtype=jnp.float32)
    scale = jnp.full((n_rbf,), math.sqrt(2.0) * cutoff / n_rbf, jnp.float32)
    inv_scale = 1.0 / scale                  # fold divides out of the kernel

    params = {
        "rbf_mu_scaled": (centers * inv_scale).reshape(1, n_rbf),
        "rbf_inv_scale": inv_scale.reshape(1, n_rbf),
        "filter_w": jax.random.normal(k_w, (n_rbf, f_total), jnp.float32)
                    * (1.0 / math.sqrt(n_rbf)),
        "filter_b": jax.random.normal(k_b, (1, f_total), jnp.float32) * 0.01,
        "embedding": jax.random.normal(
            k_e, (max_atomic_number, nr_atom_basis), jnp.float32),
    }
    return params


# -----------------------------------------------------------------------------
if __name__ == "__main__":
    # small, deterministic example shapes
    n_pairs = 16
    n_atoms = 8
    n_rbf = 16
    nr_atom_basis = 32
    nr_interaction_blocks = 2
    shared_filters = False
    cutoff = 5.0
    max_atomic_number = 32

    key = jax.random.PRNGKey(0)
    k_r, k_z, k_p = jax.random.split(key, 3)

    r_ij = jax.random.normal(k_r, (n_pairs, 3), jnp.float32) * 2.0
    d_ij = jnp.linalg.norm(r_ij, axis=-1, keepdims=True)           # (P, 1)
    atomic_numbers = jax.random.randint(k_z, (n_atoms,), 1, 20, jnp.int32)

    params = make_params(
        k_p, cutoff=cutoff, n_rbf=n_rbf,
        nr_interaction_blocks=nr_interaction_blocks,
        nr_atom_basis=nr_atom_basis, shared_filters=shared_filters,
        max_atomic_number=max_atomic_number)

    out = painn_representation(
        d_ij, r_ij, atomic_numbers, params,
        cutoff=cutoff, nr_interaction_blocks=nr_interaction_blocks,
        nr_atom_basis=nr_atom_basis, shared_filters=shared_filters)

    jax.block_until_ready(out)

    # light sanity checks on shapes / values
    assert len(out["filters"]) == nr_interaction_blocks
    for f in out["filters"]:
        assert f.shape == (n_pairs, 3 * nr_atom_basis)
        assert bool(jnp.all(jnp.isfinite(f)))
    assert out["dir_ij"].shape == (n_pairs, 3)
    assert out["per_atom_scalar_feature"].shape == (n_atoms, 1, nr_atom_basis)
    assert out["per_atom_vector_feature"].shape == (n_atoms, 3, nr_atom_basis)

    # also exercise the shared_filters path once
    params_sh = make_params(
        k_p, cutoff=cutoff, n_rbf=n_rbf,
        nr_interaction_blocks=nr_interaction_blocks,
        nr_atom_basis=nr_atom_basis, shared_filters=True,
        max_atomic_number=max_atomic_number)
    out_sh = painn_representation(
        d_ij, r_ij, atomic_numbers, params_sh,
        cutoff=cutoff, nr_interaction_blocks=nr_interaction_blocks,
        nr_atom_basis=nr_atom_basis, shared_filters=True)
    jax.block_until_ready(out_sh)
    assert out_sh["filters"][0].shape == (n_pairs, 3 * nr_atom_basis)

    print("KERNEL_OK")
</pallas_src>

<mosaic_0001>
module attributes {stable_mosaic.version = 11 : i64} {
  func.func @_pair_kernel(%arg0: i32, %arg1: memref<8x1xf32, #tpu.memory_space<vmem>>, %arg2: memref<1x16xf32, #tpu.memory_space<vmem>>, %arg3: memref<1x16xf32, #tpu.memory_space<vmem>>, %arg4: memref<16x192xf32, #tpu.memory_space<vmem>>, %arg5: memref<1x192xf32, #tpu.memory_space<vmem>>, %arg6: memref<8x96xf32, #tpu.memory_space<vmem>>, %arg7: memref<8x96xf32, #tpu.memory_space<vmem>>) attributes {dimension_semantics = [#tpu.dimension_semantics<parallel>], iteration_bounds = array<i64: 2>, scalar_prefetch = 0 : i64, scratch_operands = 0 : i64, tpu.core_type = #tpu.core_type<tc>, window_params = [{transform_indices = @transform_0, window_bounds = array<i64: 8, 1>}, {pipeline_mode = #tpu.pipeline_mode<synchronous>, transform_indices = @transform_1, window_bounds = array<i64: 1, 16>}, {pipeline_mode = #tpu.pipeline_mode<synchronous>, transform_indices = @transform_2, window_bounds = array<i64: 1, 16>}, {pipeline_mode = #tpu.pipeline_mode<synchronous>, transform_indices = @transform_3, window_bounds = array<i64: 16, 192>}, {pipeline_mode = #tpu.pipeline_mode<synchronous>, transform_indices = @transform_4, window_bounds = array<i64: 1, 192>}, {transform_indices = @transform_5, window_bounds = array<i64: 8, 96>}, {transform_indices = @transform_6, window_bounds = array<i64: 8, 96>}]} {
    %c0 = arith.constant 0 : index
    %c0_0 = arith.constant 0 : index
    %0 = vector.load %arg1[%c0, %c0_0] : memref<8x1xf32, #tpu.memory_space<vmem>>, vector<8x1xf32>
    %c0_1 = arith.constant 0 : index
    %c0_2 = arith.constant 0 : index
    %1 = vector.load %arg3[%c0_1, %c0_2] : memref<1x16xf32, #tpu.memory_space<vmem>>, vector<1x16xf32>
    %2 = vector.broadcast %0 : vector<8x1xf32> to vector<8x16xf32>
    %3 = vector.broadcast %1 : vector<1x16xf32> to vector<8x16xf32>
    %4 = arith.mulf %2, %3 : vector<8x16xf32>
    %c0_3 = arith.constant 0 : index
    %c0_4 = arith.constant 0 : index
    %5 = vector.load %arg2[%c0_3, %c0_4] : memref<1x16xf32, #tpu.memory_space<vmem>>, vector<1x16xf32>
    %6 = vector.broadcast %5 : vector<1x16xf32> to vector<8x16xf32>
    %7 = arith.subf %4, %6 : vector<8x16xf32>
    %8 = arith.mulf %7, %7 : vector<8x16xf32>
    %cst = arith.constant 0.000000e+00 : f32
    %9 = vector.broadcast %cst : f32 to vector<8x16xf32>
    %10 = arith.subf %9, %8 : vector<8x16xf32>
    %11 = math.exp %10 : vector<8x16xf32>
    %cst_5 = arith.constant 0.628318548 : f32
    %12 = vector.broadcast %cst_5 : f32 to vector<8x1xf32>
    %13 = arith.mulf %0, %12 : vector<8x1xf32>
    %14 = math.cos %13 : vector<8x1xf32>
    %cst_6 = arith.constant 1.000000e+00 : f32
    %15 = vector.broadcast %cst_6 : f32 to vector<8x1xf32>
    %16 = arith.addf %14, %15 : vector<8x1xf32>
    %cst_7 = arith.constant 5.000000e-01 : f32
    %17 = vector.broadcast %cst_7 : f32 to vector<8x1xf32>
    %18 = arith.mulf %17, %16 : vector<8x1xf32>
    %cst_8 = arith.constant 5.000000e+00 : f32
    %19 = vector.broadcast %cst_8 : f32 to vector<8x1xf32>
    %20 = arith.cmpf olt, %0, %19 : vector<8x1xf32>
    %cst_9 = arith.constant 0.000000e+00 : f32
    %21 = vector.broadcast %cst_9 : f32 to vector<8x1xf32>
    %22 = arith.select %20, %18, %21 : vector<8x1xi1>, vector<8x1xf32>
    %c0_10 = arith.constant 0 : index
    %c0_11 = arith.constant 0 : index
    %23 = vector.load %arg4[%c0_10, %c0_11] : memref<16x192xf32, #tpu.memory_space<vmem>>, vector<16x192xf32>
    %cst_12 = arith.constant dense<0.000000e+00> : vector<8x192xf32>
    %24 = tpu.matmul %11, %23, %cst_12 {dimension_numbers = #tpu.dot_dimension_numbers<[1], [0], [0], [1], [0, 0, 1, 1], [], []>} : vector<8x16xf32>, vector<16x192xf32>, vector<8x192xf32> -> vector<8x192xf32>
    %c0_13 = arith.constant 0 : index
    %c0_14 = arith.constant 0 : index
    %25 = vector.load %arg5[%c0_13, %c0_14] : memref<1x192xf32, #tpu.memory_space<vmem>>, vector<1x192xf32>
    %26 = vector.broadcast %25 : vector<1x192xf32> to vector<8x192xf32>
    %27 = arith.addf %24, %26 : vector<8x192xf32>
    %28 = vector.broadcast %22 : vector<8x1xf32> to vector<8x192xf32>
    %29 = arith.mulf %27, %28 : vector<8x192xf32>
    %30 = vector.extract_strided_slice %29 {offsets = [0, 0], sizes = [8, 96], strides = [1, 1]} : vector<8x192xf32> to vector<8x96xf32>
    %c0_15 = arith.constant 0 : index
    %c0_16 = arith.constant 0 : index
    %31 = vector.load %arg6[%c0_15, %c0_16] : memref<8x96xf32, #tpu.memory_space<vmem>>, vector<8x96xf32>
    tpu.vector_store %arg6[%c0_15, %c0_16], %30 {strides = array<i32>} : memref<8x96xf32, #tpu.memory_space<vmem>>, vector<8x96xf32>,
    %32 = vector.extract_strided_slice %29 {offsets = [0, 96], sizes = [8, 96], strides = [1, 1]} : vector<8x192xf32> to vector<8x96xf32>
    %c0_17 = arith.constant 0 : index
    %c0_18 = arith.constant 0 : index
    %33 = vector.load %arg7[%c0_17, %c0_18] : memref<8x96xf32, #tpu.memory_space<vmem>>, vector<8x96xf32>
    tpu.vector_store %arg7[%c0_17, %c0_18], %32 {strides = array<i32>} : memref<8x96xf32, #tpu.memory_space<vmem>>, vector<8x96xf32>,
    return
  }
  func.func @transform_0(%arg0: i32) -> (i32, i32) {
    %c0_i32 = arith.constant 0 : i32
    %c0_i32_0 = arith.constant 0 : i32
    return %arg0, %c0_i32 : i32, i32
  }
  func.func @transform_1(%arg0: i32) -> (i32, i32) {
    %c0_i32 = arith.constant 0 : i32
    %c0_i32_0 = arith.constant 0 : i32
    %c0_i32_1 = arith.constant 0 : i32
    return %c0_i32, %c0_i32_0 : i32, i32
  }
  func.func @transform_2(%arg0: i32) -> (i32, i32) {
    %c0_i32 = arith.constant 0 : i32
    %c0_i32_0 = arith.constant 0 : i32
    %c0_i32_1 = arith.constant 0 : i32
    return %c0_i32, %c0_i32_0 : i32, i32
  }
  func.func @transform_3(%arg0: i32) -> (i32, i32) {
    %c0_i32 = arith.constant 0 : i32
    %c0_i32_0 = arith.constant 0 : i32
    %c0_i32_1 = arith.constant 0 : i32
    return %c0_i32, %c0_i32_0 : i32, i32
  }
  func.func @transform_4(%arg0: i32) -> (i32, i32) {
    %c0_i32 = arith.constant 0 : i32
    %c0_i32_0 = arith.constant 0 : i32
    %c0_i32_1 = arith.constant 0 : i32
    return %c0_i32, %c0_i32_0 : i32, i32
  }
  func.func @transform_5(%arg0: i32) -> (i32, i32) {
    %c0_i32 = arith.constant 0 : i32
    %c0_i32_0 = arith.constant 0 : i32
    return %arg0, %c0_i32 : i32, i32
  }
  func.func @transform_6(%arg0: i32) -> (i32, i32) {
    %c0_i32 = arith.constant 0 : i32
    %c0_i32_0 = arith.constant 0 : i32
    return %arg0, %c0_i32 : i32, i32
  }
}

</mosaic_0001>

<bundles_post_ra>
// kernel: tpu_custom_call.1
= control target key start
LH: loop header
LB: loop body
LE: loop exit
PB: predicated region body
PF: predicated region fallthrough
CT: control target
= control target key end

     0   :  { %12 = vsyncpa [#allocation3], 0  ;;  %s1147_s0 = inlined_call_operand.vmem [shape: f32[16,1], index: 0, kind: input, shape index: {}]   ;;  %s1148_s1 = inlined_call_operand.vmem [shape: f32[1,16], index: 1, kind: input, shape index: {}]   ;;  %s1149_s2 = inlined_call_operand.vmem [shape: f32[1,16], index: 2, kind: input, shape index: {}]   ;;  %s1150_s3 = inlined_call_operand.hbm [shape: f32[16,192], index: 3, kind: input, shape index: {}]   ;;  %s1151_s4 = inlined_call_operand.vmem [shape: f32[1,192], index: 4, kind: input, shape index: {}]   ;;  %s1152_s5 = inlined_call_operand.hbm [shape: f32[16,96], index: 5, kind: output, shape index: {0}]   ;;  %s1153_s6 = inlined_call_operand.hbm [shape: f32[16,96], index: 6, kind: output, shape index: {1}]  }
   0x1   :  { %13 = vsyncpa [#allocation4], 0 }
   0x2   :  { %15 = vsyncpa [#allocation4 + $0x1], 0 }
   0x3   :  { %16 = vsyncpa [#allocation7], 0 }
   0x4   :  { %18 = vsyncpa [#allocation7 + $0x1], 0  ;;  %s932_s21 = smov 0   ;;  %s934_s22 = smov 0  }
   0x5   :  { %s936_s23 = smov 0   ;;  %s938_s24 = smov 0  }
   0x6 LB: > { %s953_s25 = sadd.s32 4294967295, %s881_s24   ;;  %s652_s26 = sadd.s32 4294967294, %s881_s24   ;;  %s881_s24 = sphi %s938_s24, %s1169_s24   ;;  %s877_s23 = sphi %s936_s23, %s1168_s23   ;;  %s873_s22 = sphi %s934_s22, %s1167_s22   ;;  %s869_s21 = sphi %s932_s21, %s1166_s21  }
   0x7   : > { %s957_s27 = sadd.s32 1, %s881_s24   ;;  %s141_s28 = sadd.s32 1, %s877_s23 }
   0x8   : > { %s138_s29 = ssub.s32 %s881_s24, %s957_s27  ;;  %p151_p0 = scmp.ne.s32.totalorder %s877_s23, %s873_s22 }
   0x9   : > { %p139_p1 = scmp.eq.s32.totalorder %s138_s29, 0  ;;  %p152_p2 = scmp.eq.s32.totalorder %s953_s25, 1 }
   0xa   : > { %p157_p3 = scmp.ne.s32.totalorder %s873_s22, %s869_s21  ;;  %p158_p4 = scmp.eq.s32.totalorder %s652_s26, 1 }
   0xb   : > { %s968_s30 = scalar_select %p139_p1, %s877_s23, %s141_s28  }
   0xc   : > { %p970_p5 = por %p152_p2, %p151_p0  ;;  %p974_p6 = por %p158_p4, %p157_p3 }
   0xd   : > { %p653_p7 = scmp.ge.s32.totalorder %s881_s24, 1  ;;  %p191_p8 = scmp.lt.s32.totalorder %s881_s24, 3 }
   0xe   : > { %s1157_s7 = scalar_select %p970_p5, 1, 0 }
   0xf   : > { %s1158_s8 = scalar_select %p974_p6, 1, 0 }
  0x10   : > { %p1154_p9 = scmp.eq.s32.totalorder %s953_s25, 0  ;;  %p981_p10 = pnand %p653_p7, %p191_p8 }
  0x11   : > { %s883_s10 = smov [#allocation2]   ;;  %s755_s15 = scalar_lea.hbm %s1150_s3, 512 }
  0x12   : > { %s1159_s9 = scalar_select %p981_p10, 1, 0 }
  0x13   : > { %s209_s11 = sshll.u32 %s883_s10, 4  ;;  %p690_p11 = pneg %p981_p10  ;;  %s210_s11 = int_to_ptr.vmem [resolvable:$true] %s209_s11 }
  0x14   : > { %p756_p13 = scmp.ne.s32.totalorder %s1150_s3, %s755_s15  ;;  %p762_p3 = scmp.lt.u32.totalorder %s755_s15, %s1150_s3 }
  0x15   : > { %p989_p12 = pnand %p1154_p9, %p690_p11 }
  0x17   : > { %p757_p0 = pneg %p989_p12 }
  0x19   : > { %p758_p1 = pnand %p757_p0, %p756_p13 }
  0x1b   : > { %p759_p2 = pneg %p758_p1 }
  0x1d   : > { %p764_p4 = pnand %p762_p3, %p759_p2 }
  0x1f   : > { %767 = shalt.err (!%p764_p4)
}
  0x20   : > { %s768_s20 = scalar_lea.vmem %s210_s11, 512  ;;  %p776_p9 = scmp.lt.s32.totalorder %s210_s11, %s210_s11 }
  0x21   : > { %p769_p7 = scmp.ne.s32.totalorder %s210_s11, %s768_s20  ;;  %p777_p6 = scmp.lt.s32.totalorder %s768_s20, %s768_s20 }
  0x23   : > { %p771_p8 = pnand %p769_p7, %p757_p0  ;;  %p778_p5 = por %p777_p6, %p776_p9 }
  0x25   : > { %p772_p11 = pneg %p771_p8 }
  0x27   : > { %p779_p10 = pnand %p778_p5, %p772_p11 }
  0x29   : > { %782 = shalt.err (!%p779_p10)
}
  0x2a   : > { %s884_s26 = smov 256   ;;  %s885_s28 = smov 16  }
  0x2b   : > { %693 = dma.hbm_to_vmem [thread:$0]  (!%p989_p12), %s1150_s3, 512, %s210_s11, [#allocation3], %s884_s26, %s884_s26, %s885_s28  }
  0x2c   : > { %p1161_p13 = scmp.ne.s32.totalorder %s1159_s9, 0 }
  0x2d   : > { %p1162_p1 = scmp.eq.s32.totalorder (!%p1161_p13), %s953_s25, 0 }
  0x2e   : > { %235 = sbr.rel (%p1161_p13) target bundleno = 571 (0x23b), region = 40 }
  0x35   : > { %856 = dma.done.wait (%p1162_p1), [#allocation3], 512   ;;  %p1163_p0 = pmov %p1162_p1 }
  0x36   : > { %p269_p5 = scmp.lt.s32.totalorder %s953_s25, 1  ;;  %v886_v0 = vmov 0   ;;  %v408_v8 = vld [vmem:[#allocation2 + $0x8] sm:$0xff]  ;;  %v410_v9 = vld [vmem:[#allocation2 + $0x18] sm:$0xff]  ;;  %v407_v10 = vld [vmem:[#allocation2] sm:$0xff]  ;;  %v887_v15 = vmov 0.0  }
  0x37   : > { %858 = vsyncadd (%p1163_p0), [#allocation3], 4294966784  ;;  %748 = vset.pattern.permute.xlu0 %v886_v0  ;;  %v674_v13 = vpack.c.bf16 %v410_v9, %v408_v8  ;;  %v409_v14 = vld [vmem:[#allocation2 + $0x10] sm:$0xff]  ;;  %491 = vmatprep.mubr.f32.mxu0 %v887_v15  ;;  %v888_v20 = vmov 2102212464   ;;  %vm423_vm14 = vcmask 130048  }
  0x38   : > { %s270_s13 = scalar_select %p269_p5, %s953_s25, 1  ;;  %v676_v17 = vpack.c.bf16 %v409_v14, %v407_v10  ;;  %v889_v22 = vmov 920167782   ;;  %v890_v25 = vmov 683565275   ;;  %vm505_vm15 = vcmask 785408  }
  0x39   : > { %675 = vmatprep.subr.bf16.mxu0 %v674_v13  ;;  %v891_v27 = vmov 2475754826   ;;  %v892_v29 = vmov 2131351028   ;;  %v893_v32 = vmov 1326507024  }
  0x3a   : > { %s660_s12 = sshll.u32 %s270_s13, 3  ;;  %677 = vmatpush1.bf16.msra.mxu0 %v676_v17  ;;  %s1053_s19 = sand.u32 1, %s873_s22  }
  0x3b   : > { %s272_s11 = scalar_lea.vmem %s1147_s0, %s660_s12  ;;  %s658_s28 = sshll.u32 %s1053_s19, 3 }
  0x3c   : > { %v1020_v1 = vld [vmem:[%s272_s11] sm:$0xff]  ;;  %s670_s29 = sshll.u32 %s953_s25, 7  ;;  %s261_s10 = scalar_lea.vmem [#allocation5], %s658_s28 }
  0x3d   : > { %277 = vperm.xlu0 %748, %v1020_v1   ;;  %v1024_v2 = vmul.f32 0.62831855, %v1020_v1  ;;  %vm405_vm13 = vcmp.lt.f32.partialorder %v1020_v1, 5.0  ;;  %s536_s13 = sshll.u32 %s261_s10, 4  ;;  %s1067_s15 = scalar_lea.hbm %s1152_s5, %s670_s29  ;;  %s1069_s13 = int_to_ptr.vmem [resolvable:$true] %s536_s13 }
  0x3e   : > { %s894_s11 = smov 32   ;;  %s518_s9 = scalar_lea.sflag [#allocation4], %s1053_s19 }
  0x3f   : > { %v303_v3 = vand.u32 2139095040, %v1024_v2  ;;  %v300_v6 = vand.u32 2147483647, %v1024_v2  ;;  %vm302_vm7 = vcmp.lt.s32.totalorder %v1024_v2, 0  ;;  %vm392_vm12 = vweird.f32 %v1024_v2  ;;  %s783_s16 = scalar_lea.vmem %s1069_s13, 128  ;;  %p1164_p9 = scmp.ne.s32.totalorder %s1157_s7, 0 }
  0x40   : > { %p784_p6 = scmp.ne.s32.totalorder %s1069_s13, %s783_s16  ;;  %s895_s17 = smov [#allocation5]  }
  0x41   : > { %v304_v4 = vshrl.u32 %v303_v3, 23  ;;  %v307_v12 = vand.u32 8388607, %v300_v6  ;;  %vm301_vm8 = vcmp.le.f32.partialorder %v300_v6, 0.7853982  ;;  %s787_s18 = sshll.u32 %s895_s17, 4  ;;  %s788_s18 = int_to_ptr.vmem [resolvable:$false] %s787_s18 }
  0x42   : > { %p785_p10 = pnand %p784_p6, %p1164_p9  ;;  %s789_s20 = scalar_lea.vmem %s788_s18, 256 }
  0x43   : > { %v663_v5 = vadd.s32 4294967169, %v304_v4  ;;  %v308_v24 = vor.u32 8388608, %v307_v12  ;;  %p790_p2 = scmp.lt.s32.totalorder %s1069_s13, %s788_s18  ;;  %p791_p3 = scmp.lt.s32.totalorder %s789_s20, %s783_s16 }
  0x44   : > { %p786_p12 = pneg %p785_p10 }
  0x45   : > { %v310_v7 = vadd.s32 1, %v663_v5  ;;  %v348_v43 = vshll.u32 %v308_v24, 8  ;;  %p792_p4 = por %p791_p3, %p790_p2 }
  0x47   : > { %vm311_vm0 = vcmp.gt.s32.totalorder %v310_v7, 0  ;;  %p793_p7 = pnand %p792_p4, %p786_p12 }
  0x48   : > { %v312_v11 = vsel %vm311_vm0, %v310_v7, 0 }
  0x49   : > { %v314_v16 = vand.u32 31, %v312_v11  ;;  %v313_v18 = vshrl.u32 %v312_v11, 5 }
  0x4b   : > { %v315_v19 = vsub.s32 32, %v314_v16  ;;  %v326_v21 = vshll.u32 %v888_v20, %v314_v16  ;;  %v329_v23 = vshll.u32 %v889_v22, %v314_v16  ;;  %v317_v26 = vshll.u32 %v890_v25, %v314_v16 }
  0x4c   : > { %v320_v28 = vshll.u32 %v891_v27, %v314_v16  ;;  %v323_v30 = vshll.u32 %v892_v29, %v314_v16  ;;  %vm335_vm1 = vcmp.lt.s32.totalorder %v313_v18, 4  ;;  %vm332_vm2 = vcmp.lt.s32.totalorder %v313_v18, 1 }
  0x4d   : > { %v327_v31 = vshrl.u32 %v889_v22, %v315_v19  ;;  %v330_v33 = vshrl.u32 %v893_v32, %v315_v19  ;;  %v316_v34 = vshrl.u32 %v890_v25, %v315_v19  ;;  %v318_v35 = vshrl.u32 %v891_v27, %v315_v19 }
  0x4e   : > { %v321_v36 = vshrl.u32 %v892_v29, %v315_v19  ;;  %v324_v37 = vshrl.u32 %v888_v20, %v315_v19  ;;  %vm334_vm3 = vcmp.lt.s32.totalorder %v313_v18, 3  ;;  %vm333_vm4 = vcmp.lt.s32.totalorder %v313_v18, 2 }
  0x4f   : > { %v328_v38 = vor.u32 %v327_v31, %v326_v21  ;;  %v331_v39 = vor.u32 %v330_v33, %v329_v23  ;;  %v319_v40 = vor.u32 %v318_v35, %v317_v26 }
  0x50   : > { %v322_v41 = vor.u32 %v321_v36, %v320_v28  ;;  %v325_v42 = vor.u32 %v324_v37, %v323_v30 }
  0x51   : > { %v341_v44 = vsel %vm335_vm1, %v328_v38, 920167782  ;;  %v345_v45 = vsel %vm335_vm1, %v331_v39, 1326507024  ;;  %v336_v46 = vsel %vm332_vm2, %v316_v34, %v319_v40 }
  0x52   : > { %v337_v47 = vsel %vm335_vm1, %v325_v42, 2102212464  ;;  %v340_v48 = vsel %vm332_vm2, %v319_v40, %v322_v41  ;;  %v342_v49 = vsel %vm334_vm3, %v325_v42, %v341_v44  ;;  %v344_v50 = vsel %vm332_vm2, %v322_v41, %v325_v42  ;;  %v662_v42 = vld [vmem:[%s1148_s1] ss:$0 sm:$0xff] }
  0x53   : > { %v338_v51 = vsel %vm334_vm3, %v322_v41, %v337_v47  ;;  %v343_v52 = vsel %vm333_vm4, %v340_v48, %v342_v49  ;;  %v346_v53 = vsel %vm334_vm3, %v328_v38, %v345_v45  ;;  %v661_v41 = vld [vmem:[%s1149_s2] ss:$0 sm:$0xff]  ;;  %v413_v48 = vlaneseq }
  0x54   : > { %v339_v54 = vsel %vm333_vm4, %v336_v46, %v338_v51  ;;  %v347_v55 = vsel %vm333_vm4, %v344_v50, %v346_v53  ;;  %v1030_v56 = vmul.u32.u64.low %v348_v43, %v343_v52  ;;  %v1031_v57 = vmul.u32.u64.high %v348_v43, %v343_v52, %v1030_v56  ;;  %v411_v51 = vld [vmem:[%s1151_s4] sm:$0x3] }
  0x55   : > { %v1033_v58 = vmul.u32.u64.low %v348_v43, %v347_v55  ;;  %v1034_v59 = vmul.u32.u64.high %v348_v43, %v347_v55, %v1033_v58  ;;  %v355_v60 = vmul.u32 %v348_v43, %v339_v54  ;;  %v414_v49 = vshrl.u32 %v413_v48, 7 }
  0x56   : > { %v358_v61 = vadd.s32 1, %v1031_v57 }
  0x57   : > { %vm357_vm5 = vc.u32 %v1034_v59, %v1030_v56  ;;  %v356_v11 = vadd.s32 %v1030_v56, %v1034_v59  ;;  %v415_v50 = vsub.s32 0, %v414_v49  ;;  %v419_v52 = vsub.s32 1, %v414_v49 }
  0x58   : > { %v359_v62 = vsel %vm357_vm5, %v358_v61, %v1031_v57 }
  0x59   : > { %v360_v63 = vadd.s32 %v359_v62, %v355_v60  ;;  %v416_v53 = vrot.slane %v411_v51, %v415_v50  ;;  %v420_v54 = vrot.slane %v411_v51, %v419_v52 }
  0x5b   : > { %v361_v0 = vadd.s32 536870912, %v360_v63 }
  0x5d   : > { %v362_v3 = vshrl.u32 %v361_v0, 30 }
  0x5f   : > { %v363_v4 = vshll.u32 %v362_v3, 30  ;;  %v386_v25 = vsub.s32 4, %v362_v3 }
  0x61   : > { %v364_v5 = vsub.s32 %v360_v63, %v363_v4  ;;  %v387_v28 = vsel %vm302_vm7, %v386_v25, %v362_v3 }
  0x62   : > { %v389_v29 = vsel %vm301_vm8, 0, %v387_v28 }
  0x63   : > { %v366_v7 = vsub.s32 0, %v364_v5  ;;  %v393_v30 = vand.u32 3, %v389_v29 }
  0x65   : > { %v664_v8 = vmin.u32 %v366_v7, %v364_v5  ;;  %vm398_vm9 = vcmp.eq.s32.totalorder %v393_v30, 2  ;;  %vm395_vm10 = vcmp.eq.s32.totalorder %v393_v30, 0  ;;  %vm394_vm11 = vcmp.lt.s32.totalorder %v393_v30, 2 }
  0x67   : > { %v368_v9 = vclz %v664_v8 }
  0x69   : > { %v665_v10 = vadd.s32 4294967294, %v368_v9 }
  0x6b   : > { %vm666_vm6 = vcmp.lt.s32.totalorder %v665_v10, 0 }
  0x6c   : > { %v371_v12 = vsel %vm666_vm6, 0, %v665_v10 }
  0x6d   : > { %v372_v13 = vsub.s32 32, %v371_v12  ;;  %v373_v14 = vshll.u32 %v364_v5, %v371_v12  ;;  %v376_v15 = vsub.s32 4294967266, %v371_v12 }
  0x6f   : > { %v374_v16 = vshrl.u32 %v356_v11, %v372_v13  ;;  %v377_v17 = vadd.s32 127, %v376_v15 }
  0x71   : > { %v375_v18 = vor.u32 %v374_v16, %v373_v14  ;;  %v378_v19 = vshll.u32 %v377_v17, 23 }
  0x73   : > { %v379_v20 = vor.u32 4788187, %v378_v19  ;;  %v382_v21 = vcvt.s32.f32 %v375_v18 }
  0x75   : > { %v380_v22 = vand.u32 2147483647, %v379_v20 }
  0x77   : > { %v383_v23 = vmul.f32 %v382_v21, %v380_v22 }
  0x79   : > { %v384_v24 = vxor.u32 2147483648, %v383_v23 }
  0x7b   : > { %v385_v26 = vsel %vm302_vm7, %v384_v24, %v383_v23 }
  0x7c   : > { %v388_v27 = vsel %vm301_vm8, %v1024_v2, %v385_v26 }
  0x7d   : > { %749 = vcosq.f32 %v388_v27 }
  0x7e   : > { %751 = vsinq.f32 %v388_v27 }
  0x87   : > { %v750_v31 = vpop.eup %749 }
  0x88   : > { %v752_v32 = vpop.eup %751  ;;  %v399_v33 = vxor.u32 2147483648, %v750_v31 }
  0x89   : > { %v396_v34 = vxor.u32 2147483648, %v752_v32 }
  0x8a   : > { %v400_v6 = vsel %vm398_vm9, %v399_v33, %v752_v32 }
  0x8b   : > { %v397_v35 = vsel %vm395_vm10, %v750_v31, %v396_v34 }
  0x8c   : > { %v401_v36 = vsel %vm394_vm11, %v397_v35, %v400_v6 }
  0x8d   : > { %v402_v37 = vsel %vm392_vm12, nan, %v401_v36 }
  0x8e   : > { %v403_v38 = vadd.f32 1.0, %v402_v37 }
  0x90   : > { %v404_v39 = vmul.f32 0.5, %v403_v38 }
  0x92   : > { %v406_v40 = vsel %vm405_vm13, %v404_v39, 0.0 }
  0x93   : > { %500 = vperm.xlu0 %748, %v406_v40  }
  0xbc   : > { %v278_v2 = vpop.permute.xlu0 %277 }
  0xbd   : > { %v286_v43 = vmul.f32 %v661_v41, %v278_v2 }
  0xbf   : > { %v294_v44 = vsub.f32 %v286_v43, %v662_v42 }
  0xc1   : > { %v295_v45 = vmul.f32 %v294_v44, %v294_v44 }
  0xc3   : > { %v296_v46 = vsub.f32 0.0, %v295_v45 }
  0xc5   : > { %v297_v47 = vmul.f32 1.442695, %v296_v46 }
  0xc7   : > { %753 = vpow2.f32 %v297_v47 }
  0xd1   : > { %v754_v1 = vpop.eup %753 }
  0xd2   : > { %667 = vmatmul.mubr.msk.f32.vlgmr.msra.gmra.mrb[0].mxu0 %vm423_vm14, %v754_v1 }
 0x112   : > { %v501_v58 = vpop.permute.xlu0 %500 }
 0x1a5   : > { %v493_v55 = vpop.f32.mrb[0].mxu0 }
 0x1a6   : > { %v494_v56 = vadd.f32 %v493_v55, %v416_v53  ;;  %v495_v57 = vpop.f32.mrb[1].mxu0 }
 0x1a7   : > { %v496_v59 = vadd.f32 %v495_v57, %v420_v54 }
 0x1a8   : > { %v503_v60 = vmul.f32 %v501_v58, %v494_v56 }
 0x1aa   : > { %509 = vrot.lane.b32.xlu1 %v503_v60, %s894_s11  ;;  %506 = vst.msk [vmem:[%s261_s10] sm:$0xff] %vm505_vm15, %v503_v60 }
 0x1ab   : > { %796 = shalt.err (!%p793_p7)
}
 0x1ac   : > { %s797_s26 = scalar_lea.hbm %s1067_s15, 128  ;;  %s801_s14 = scalar_lea.hbm %s1152_s5, 256 }
 0x1ad   : > { %p798_p8 = scmp.ne.s32.totalorder %s1067_s15, %s797_s26  ;;  %p802_p1 = scmp.lt.u32.totalorder %s1067_s15, %s1152_s5 }
 0x1ae   : > { %p803_p0 = scmp.lt.u32.totalorder %s801_s14, %s797_s26  ;;  %p805_p6 = scmp.lt.u32.totalorder %s797_s26, %s1067_s15 }
 0x1af   : > { %p799_p11 = pnand %p798_p8, %p1164_p9 }
 0x1b0   : > { %p804_p5 = por %p803_p0, %p802_p1 }
 0x1b1   : > { %p800_p13 = pneg %p799_p11 }
 0x1b2   : > { %p806_p10 = por %p805_p6, %p804_p5 }
 0x1b4   : > { %p807_p12 = pnand %p806_p10, %p800_p13 }
 0x1b6   : > { %810 = shalt.err (!%p807_p12)
}
 0x1b7   : > { %686 = dma.vmem_to_hbm [thread:$0]  (%p1164_p9), %s1069_s13, 128, %s1067_s15, %s518_s9   ;;  %v504_v61 = vmul.f32 %v501_v58, %v496_v59  ;;  %vm513_vm0 = vcmask 261120  }
 0x1b8   : > { %s268_s16 = scalar_lea.vmem [#allocation6], %s658_s28  ;;  %s1103_s12 = scalar_lea.hbm %s1153_s6, %s670_s29 }
 0x1b9   : > { %511 = vrot.lane.b32.xlu1 %v504_v61, %s894_s11  ;;  %s549_s20 = sshll.u32 %s268_s16, 4  ;;  %s523_s13 = scalar_lea.sflag [#allocation7], %s1053_s19  ;;  %s1105_s20 = int_to_ptr.vmem [resolvable:$true] %s549_s20 }
 0x1ba   : > { %s811_s15 = scalar_lea.vmem %s1105_s20, 128  ;;  %s896_s25 = smov [#allocation6]  }
 0x1bb   : > { %p812_p2 = scmp.ne.s32.totalorder %s1105_s20, %s811_s15  ;;  %s815_s28 = sshll.u32 %s896_s25, 4  ;;  %s816_s28 = int_to_ptr.vmem [resolvable:$false] %s815_s28 }
 0x1bc   : > { %s817_s11 = scalar_lea.vmem %s816_s28, 256  ;;  %p818_p7 = scmp.lt.s32.totalorder %s1105_s20, %s816_s28 }
 0x1bd   : > { %p813_p3 = pnand %p812_p2, %p1164_p9  ;;  %p819_p8 = scmp.lt.s32.totalorder %s817_s11, %s811_s15 }
 0x1bf   : > { %p814_p4 = pneg %p813_p3  ;;  %p820_p11 = por %p819_p8, %p818_p7 }
 0x1c1   : > { %p821_p13 = pnand %p820_p11, %p814_p4 }
 0x21c   : > { %v510_v62 = vpop.permute.xlu1 %509 }
 0x22b   : > { %v512_v63 = vpop.permute.xlu1 %511 }
 0x22c   : > { %v514_v0 = vsel %vm513_vm0, %v510_v62, %v512_v63 }
 0x22d   : > { %516 = vst.msk [vmem:[%s268_s16] sm:$0xff] %vm505_vm15, %v514_v0 }
 0x22e   : > { %824 = shalt.err (!%p821_p13)
}
 0x22f   : > { %s825_s19 = scalar_lea.hbm %s1103_s12, 128  ;;  %s829_s14 = scalar_lea.hbm %s1153_s6, 256 }
 0x230   : > { %p826_p1 = scmp.ne.s32.totalorder %s1103_s12, %s825_s19  ;;  %p830_p6 = scmp.lt.u32.totalorder %s1103_s12, %s1153_s6 }
 0x231   : > { %p831_p10 = scmp.lt.u32.totalorder %s829_s14, %s825_s19  ;;  %p833_p2 = scmp.lt.u32.totalorder %s825_s19, %s1103_s12 }
 0x232   : > { %p827_p0 = pnand %p826_p1, %p1164_p9 }
 0x233   : > { %p832_p12 = por %p831_p10, %p830_p6 }
 0x234   : > { %p828_p5 = pneg %p827_p0 }
 0x235   : > { %p834_p3 = por %p833_p2, %p832_p12 }
 0x237   : > { %p835_p4 = pnand %p834_p3, %p828_p5 }
 0x239   : > { %838 = shalt.err (!%p835_p4)
}
 0x23a   : > { %687 = dma.vmem_to_hbm [thread:$0]  (%p1164_p9), %s1105_s20, 128, %s1103_s12, %s523_s13  }
 0x23b PF: > { %p703_p7 = scmp.ge.s32.totalorder %s881_s24, 2  ;;  %s561_s16 = sand.u32 1, %s869_s21  }
 0x23c   : > { %p1165_p8 = scmp.ne.s32.totalorder %s1158_s8, 0  ;;  %s562_s26 = scalar_lea.sflag [#allocation4], %s561_s16 }
 0x23e   : > { %p695_p11 = pnand %p703_p7, %p1165_p8 }
 0x240   : > { %860 = dma.done.wait (!%p695_p11), %s562_s26, 128  }
 0x241   : > { %862 = vsyncadd (!%p695_p11), %s562_s26, 4294967168  ;;  %s571_s10 = scalar_lea.sflag [#allocation7], %s561_s16 }
 0x242   : > { %864 = dma.done.wait (!%p695_p11), %s571_s10, 128  }
 0x243   : > { %866 = vsyncadd (!%p695_p11), %s571_s10, 4294967168  ;;  %p21_p9 = scmp.ge.s32.totalorder %s957_s27, 4   ;;  %s1166_s21 = smov %s873_s22 }
 0x244   : > { %s1167_s22 = smov %s877_s23  ;;  %s1168_s23 = smov %s968_s30 }
 0x245   : > { %s1169_s24 = smov %s957_s27  ;;  %23 = sbr.rel (!%p21_p9) target bundleno = 6 (0x6), region = 97 }
 0x24c   :  { %576 = vsyncpa [#allocation3], 1 }
 0x24d   :  { %578 = vsyncpa [#allocation3 + $0x1], 1 }
 0x24e   :  { %579 = vsyncpa [#allocation4], 1 }
 0x24f   :  { %581 = vsyncpa [#allocation4 + $0x1], 1 }
 0x250   :  { %582 = vsyncpa [#allocation7], 1 }
 0x251   :  { %584 = vsyncpa [#allocation7 + $0x1], 1 }

</bundles_post_ra>
